<compile_context>
chip_gen: v5e
topology: v5e:2x2
jax: 0.10.0
libtpu: 0.0.40
codegen_flags: <defaults>
</compile_context>

<pallas_src>
import functools

import jax
import jax.numpy as jnp
from jax.experimental import pallas as pl
from jax.experimental.pallas import tpu as pltpu

EPS = 1e-10
_MIB = 1 << 20


# ----------------------------- sizing helpers -----------------------------

def _round_up(n, m):
    return ((n + m - 1) // m) * m


def _round_down(n, m):
    return max(m, (n // m) * m)


def _sublane_multiple(dtype):
    """Native packed sublane tile: 8 rows for 32-bit, 16 for 16-bit, 32 for 8-bit."""
    itemsize = jnp.dtype(dtype).itemsize
    return 8 * max(1, 4 // itemsize)


def _device_kind():
    try:
        return (jax.devices()[0].device_kind or "").lower()
    except Exception:
        return ""


def _vmem_capacity_bytes():
    try:
        info = pltpu.get_tpu_info()
        cap = getattr(info, "vmem_capacity_bytes", None)
        if cap:
            return int(cap)
    except Exception:
        pass
    # v7x has 64 MiB/TC; v5e/v6e have 128 MiB.
    return 64 * _MIB if "v7" in _device_kind() else 128 * _MIB


def _num_tensorcores():
    kind = _device_kind()
    for tag in ("v7", "v5p", "v4"):
        if tag in kind:
            return 2
    return 1


def _choose_row_block(n_rows, row_bytes, sub, target_tile_bytes, num_cores):
    """Dtype-aligned row block streaming ~target_tile_bytes per grid step."""
    rb = _round_down(max(sub, target_tile_bytes // max(1, row_bytes)), sub)
    rb = min(rb, _round_down(n_rows, sub))
    if num_cores >= 2:
        # Prefer tile size over step count: only split across the two
        # TensorCores if each resulting tile still amortizes the ~0.35us
        # per-step cost (>= ~2 MiB), and keep the step count even.
        half = _round_up(pl.cdiv(n_rows, 2), sub)
        if half * row_bytes >= 2 * _MIB:
            rb = min(rb, half)
        steps = pl.cdiv(n_rows, rb)
        if steps > 1 and steps % 2 == 1:
            rb = _round_up(pl.cdiv(n_rows, steps + 1), sub)
    return rb


# --------------------------------- kernels ---------------------------------

def _l1norm_kernel(x_ref, o_ref):
    # Full-D row block: per-row L1 reduce + rescale in one pass (f32 math).
    x = x_ref[...].astype(jnp.float32)
    norm = jnp.sum(jnp.abs(x), axis=-1, keepdims=True) + EPS
    o_ref[...] = (x * pl.reciprocal(norm)).astype(o_ref.dtype)


def _partial_norm_kernel(x_ref, inv_ref, *, d_total, d_chunk):
    # Pass 1 of the wide-D path: accumulate sum(|x|) over D chunks into an
    # f32 (rows, 1) output block that stays resident across the D ("arbitrary")
    # grid axis; on the last chunk convert to 1 / (norm + eps).
    j = pl.program_id(1)

    @pl.when(j == 0)
    def _():
        inv_ref[...] = jnp.zeros_like(inv_ref)

    x = x_ref[...].astype(jnp.float32)
    lane = jax.lax.broadcasted_iota(jnp.int32, x.shape, dimension=1)
    keep = (j * d_chunk + lane) < d_total          # mask padded lanes of last chunk
    inv_ref[...] += jnp.sum(jnp.where(keep, jnp.abs(x), 0.0),
                            axis=-1, keepdims=True)

    @pl.when(j == pl.num_programs(1) - 1)
    def _():
        inv_ref[...] = pl.reciprocal(inv_ref[...] + EPS)


def _scale_kernel(x_ref, inv_ref, o_ref):
    # Pass 2 of the wide-D path: out = x * (1/norm).
    o_ref[...] = (x_ref[...].astype(jnp.float32) * inv_ref[...]).astype(o_ref.dtype)


# -------------------------------- wrappers ---------------------------------

def _l1norm_wide_d(x, row_block, d_chunk, vmem_limit_bytes):
    """Two-pass L1 norm for very wide D (full-D row tiles don't fit VMEM)."""
    N, D = x.shape
    itemsize = jnp.dtype(x.dtype).itemsize
    n_i = pl.cdiv(N, row_block)
    n_j = pl.cdiv(D, d_chunk)

    inv = pl.pallas_call(
        functools.partial(_partial_norm_kernel, d_total=D, d_chunk=d_chunk),
        out_shape=jax.ShapeDtypeStruct((N, 1), jnp.float32),
        grid_spec=pltpu.PrefetchScalarGridSpec(
            num_scalar_prefetch=0,
            grid=(n_i, n_j),
            in_specs=[pl.BlockSpec((row_block, d_chunk), lambda i, j: (i, j))],
            out_specs=pl.BlockSpec((row_block, 1), lambda i, j: (i, 0)),
        ),
        compiler_params=pltpu.CompilerParams(
            dimension_semantics=("parallel", "arbitrary"),
            vmem_limit_bytes=vmem_limit_bytes,
        ),
        cost_estimate=pl.CostEstimate(
            flops=2 * N * D, transcendentals=0,
            bytes_accessed=N * D * itemsize + N * 4),
    )(x)

    return pl.pallas_call(
        _scale_kernel,
        out_shape=jax.ShapeDtypeStruct((N, D), x.dtype),
        grid_spec=pltpu.PrefetchScalarGridSpec(
            num_scalar_prefetch=0,
            grid=(n_i, n_j),
            in_specs=[pl.BlockSpec((row_block, d_chunk), lambda i, j: (i, j)),
                      pl.BlockSpec((row_block, 1), lambda i, j: (i, 0))],
            out_specs=pl.BlockSpec((row_block, d_chunk), lambda i, j: (i, j)),
        ),
        compiler_params=pltpu.CompilerParams(
            dimension_semantics=("parallel", "parallel"),
            vmem_limit_bytes=vmem_limit_bytes,
        ),
        cost_estimate=pl.CostEstimate(
            flops=N * D, transcendentals=0,
            bytes_accessed=2 * N * D * itemsize + N * 4),
    )(x, inv)


def l1norm(x, *, target_tile_bytes=8 * _MIB, vmem_limit_bytes=None,
           _force_d_chunk=None):
    """L1-normalize x of shape [N, D] along dim=1 (matches the PyTorch module)."""
    N, D = x.shape
    itemsize = jnp.dtype(x.dtype).itemsize
    row_bytes = D * itemsize
    sub = _sublane_multiple(x.dtype)
    vmem_cap = _vmem_capacity_bytes()
    num_cores = _num_tensorcores()

    # VMEM budget available to the pipeline's double buffers.
    budget = int(0.75 * vmem_cap) if vmem_limit_bytes is None else int(vmem_limit_bytes)

    # --- wide-D fallback: even the minimal (sub x full-D) double-buffered
    #     in+out working set would blow the VMEM budget -> split the D axis.
    min_rows = sub if N >= sub else max(N, 1)
    min_working_set = 4 * min_rows * row_bytes
    if _force_d_chunk is not None or min_working_set > budget:
        if _force_d_chunk is not None:
            d_chunk = int(_force_d_chunk)
        else:
            d_chunk = _round_down(budget // (4 * min_rows * itemsize), 128)
            if D >= 128:
                d_chunk = min(d_chunk, _round_down(D, 128))
            else:
                d_chunk = D
        d_chunk = max(d_chunk, min(D, 128))
        row_block = min_rows
        limit = vmem_limit_bytes
        if limit is None:
            limit = min(int(0.75 * vmem_cap),
                        max(32 * _MIB, 6 * row_block * d_chunk * itemsize))
        return _l1norm_wide_d(x, row_block, d_chunk, limit)

    # --- main streaming path: full-D row blocks, auto-pipelined BlockSpecs.
    if N < sub:
        row_block = N  # full-extent block is exempt from the (8,128) rule
    else:
        row_block = _choose_row_block(N, row_bytes, sub,
                                      min(target_tile_bytes, budget // 4),
                                      num_cores)

    if vmem_limit_bytes is None:
        working_set = 4 * row_block * row_bytes  # in+out, double-buffered
        vmem_limit_bytes = min(int(0.75 * vmem_cap),
                               max(32 * _MIB, int(1.5 * working_set)))

    grid = (pl.cdiv(N, row_block),)  # ragged last block: OOB writes dropped
    # NOTE: for production shapes with D < 128 the stores are lane-masked; a
    # lane-dense repack in the wrapper would be the next lever for that regime.
    return pl.pallas_call(
        _l1norm_kernel,
        out_shape=jax.ShapeDtypeStruct((N, D), x.dtype),
        grid_spec=pltpu.PrefetchScalarGridSpec(
            num_scalar_prefetch=0,
            grid=grid,
            in_specs=[pl.BlockSpec((row_block, D), lambda i: (i, 0))],
            out_specs=pl.BlockSpec((row_block, D), lambda i: (i, 0)),
        ),
        compiler_params=pltpu.CompilerParams(
            dimension_semantics=("parallel",),
            vmem_limit_bytes=int(vmem_limit_bytes),
        ),
        cost_estimate=pl.CostEstimate(
            flops=2 * N * D, transcendentals=0,
            bytes_accessed=2 * N * D * itemsize),
    )(x)


# ---------------------------------- demo -----------------------------------

if __name__ == "__main__":
    key = jax.random.PRNGKey(0)
    k1, k2, k3, k4 = jax.random.split(key, 4)

    def ref_l1norm(x):
        xf = x.astype(jnp.float32)
        out = xf / (jnp.sum(jnp.abs(xf), axis=1, keepdims=True) + EPS)
        return out.astype(x.dtype)

    def check(out, x, atol, rtol):
        assert out.shape == x.shape and out.dtype == x.dtype
        ref = ref_l1norm(x)
        assert jnp.allclose(out.astype(jnp.float32), ref.astype(jnp.float32),
                            atol=atol, rtol=rtol)

    # small demo consistent with the module's forward (batch of feature rows)
    x_small = jax.random.normal(k1, (16, 32), dtype=jnp.float32)
    out_small = jax.block_until_ready(l1norm(x_small))
    check(out_small, x_small, atol=1e-6, rtol=1e-5)

    # ragged-N, lane-dense case exercising the main streaming path
    x_big = jax.random.normal(k2, (1000, 256), dtype=jnp.float32)
    out_big = jax.block_until_ready(l1norm(x_big))
    check(out_big, x_big, atol=1e-6, rtol=1e-5)

    # bf16 case exercising the dtype-aware (16-row) sublane rounding
    x_bf16 = jax.random.normal(k3, (96, 256), dtype=jnp.bfloat16)
    out_bf16 = jax.block_until_ready(l1norm(x_bf16))
    check(out_bf16, x_bf16, atol=1e-2, rtol=2e-2)

    # exercise the wide-D two-pass fallback at a small shape (forced D chunking)
    x_wide = jax.random.normal(k4, (64, 384), dtype=jnp.float32)
    out_wide = jax.block_until_ready(l1norm(x_wide, _force_d_chunk=128))
    check(out_wide, x_wide, atol=1e-6, rtol=1e-5)

    print("KERNEL_OK")
</pallas_src>

<mosaic_0001>
module attributes {stable_mosaic.version = 11 : i64} {
  func.func @_l1norm_kernel(%arg0: i32, %arg1: memref<16x32xf32, #tpu.memory_space<vmem>>, %arg2: memref<16x32xf32, #tpu.memory_space<vmem>>) attributes {dimension_semantics = [#tpu.dimension_semantics<parallel>], iteration_bounds = array<i64: 1>, scalar_prefetch = 0 : i64, scratch_operands = 0 : i64, tpu.core_type = #tpu.core_type<tc>, window_params = [{transform_indices = @transform_0, window_bounds = array<i64: 16, 32>}, {transform_indices = @transform_1, window_bounds = array<i64: 16, 32>}]} {
    %c0 = arith.constant 0 : index
    %c0_0 = arith.constant 0 : index
    %0 = vector.load %arg1[%c0, %c0_0] : memref<16x32xf32, #tpu.memory_space<vmem>>, vector<16x32xf32>
    %1 = math.absf %0 : vector<16x32xf32>
    %cst = arith.constant dense<0.000000e+00> : vector<16xf32>
    %2 = vector.multi_reduction <add>, %1, %cst [1] : vector<16x32xf32> to vector<16xf32>
    %3 = vector.shape_cast %2 : vector<16xf32> to vector<16x1xf32>
    %cst_1 = arith.constant 1.000000e-10 : f32
    %4 = vector.broadcast %cst_1 : f32 to vector<16x1xf32>
    %5 = arith.addf %3, %4 : vector<16x1xf32>
    %6 = tpu.reciprocal %5 : vector<16x1xf32> -> vector<16x1xf32>
    %7 = vector.broadcast %6 : vector<16x1xf32> to vector<16x32xf32>
    %8 = arith.mulf %0, %7 : vector<16x32xf32>
    %c0_2 = arith.constant 0 : index
    %c0_3 = arith.constant 0 : index
    %9 = vector.load %arg2[%c0_2, %c0_3] : memref<16x32xf32, #tpu.memory_space<vmem>>, vector<16x32xf32>
    tpu.vector_store %arg2[%c0_2, %c0_3], %8 {strides = array<i32>} : memref<16x32xf32, #tpu.memory_space<vmem>>, vector<16x32xf32>,
    return
  }
  func.func @transform_0(%arg0: i32) -> (i32, i32) {
    %c0_i32 = arith.constant 0 : i32
    %c0_i32_0 = arith.constant 0 : i32
    return %arg0, %c0_i32 : i32, i32
  }
  func.func @transform_1(%arg0: i32) -> (i32, i32) {
    %c0_i32 = arith.constant 0 : i32
    %c0_i32_0 = arith.constant 0 : i32
    return %arg0, %c0_i32 : i32, i32
  }
}

</mosaic_0001>

<bundles_post_ra>
// kernel: tpu_custom_call.1
= control target key start
LH: loop header
LB: loop body
LE: loop exit
PB: predicated region body
PF: predicated region fallthrough
CT: control target
= control target key end

     0   :  { %6 = vsyncpa [#allocation3], 0  ;;  %s179_s0 = inlined_call_operand.hbm [shape: f32[16,32], index: 0, kind: input, shape index: {}]   ;;  %s180_s1 = inlined_call_operand.hbm [shape: f32[16,32], index: 1, kind: output, shape index: {}]  }
   0x1   :  { %7 = vsyncpa [#allocation4], 0  ;;  %s12_s8 = sshll.u32 %s179_s0, 4  ;;  %s149_s9 = smov [#allocation2]   ;;  %s13_s8 = int_to_ptr.hbm [resolvable:$true] %s12_s8 }
   0x2   :  { %s14_s10 = sshll.u32 %s149_s9, 4  ;;  %s150_s11 = smov 128   ;;  %s15_s10 = int_to_ptr.vmem [resolvable:$true] %s14_s10 }
   0x3   :  { %s151_s12 = smov 8  }
   0x4   :  { %20 = dma.hbm_to_vmem [thread:$0]  %s13_s8, 256, %s15_s10, [#allocation3], %s150_s11, %s150_s11, %s151_s12  }
   0x5   :  { %145 = dma.done.wait [#allocation3], 256  }
   0x6   :  { %146 = vsyncadd [#allocation3], 4294967040  ;;  %v25_v0 = vld [vmem:[#allocation2] sm:$0xff]  ;;  %vm29_vm0 = vcmask 261120   ;;  %v26_v2 = vld [vmem:[#allocation2 + $0x8] sm:$0xff]  ;;  %s152_s0 = smov [#allocation5]  }
   0x7   :  { %v27_v1 = vand.u32 2147483647, %v25_v0  ;;  %v28_v4 = vand.u32 2147483647, %v26_v2  ;;  %s74_s13 = sshll.u32 %s152_s0, 4  ;;  %s76_s16 = sshll.u32 %s180_s1, 4  ;;  %s75_s13 = int_to_ptr.vmem [resolvable:$true] %s74_s13  ;;  %s77_s16 = int_to_ptr.hbm [resolvable:$true] %s76_s16 }
   0x9   :  { %v30_v3 = vsel %vm29_vm0, %v27_v1, 0.0  ;;  %v33_v5 = vsel %vm29_vm0, %v28_v4, 0.0 }
   0xa   :  { %31 = vadd.xlane.f32.xlu0 %v30_v3 }
  0x12   :  { %34 = vadd.xlane.f32.xlu0 %v33_v5 }
  0x7d   :  { %v32_v6 = vpop.xlane.xlu0 %31 }
  0x7e   :  { %v36_v7 = vadd.f32 1e-10, %v32_v6 }
  0x80   :  { %93 = vrcp.f32 %v36_v7  ;;  %v49_v13 = vand.u32 2147483648, %v36_v7  ;;  %v47_v15 = vand.u32 2147483647, %v36_v7  ;;  %vm43_vm2 = vweird.f32 %v36_v7 }
  0x82   :  { %v50_v18 = vor.u32 1.1754944e-38, %v49_v13  ;;  %vm48_vm4 = vcmp.eq.f32.partialorder %v47_v15, 8.507059e+37 }
  0x85   :  { %v35_v8 = vpop.xlane.xlu0 %34 }
  0x86   :  { %v94_v9 = vpop.eup %93  ;;  %v37_v10 = vadd.f32 1e-10, %v35_v8 }
  0x87   :  { %v39_v11 = vmul.f32 %v94_v9, %v36_v7  ;;  %vm44_vm1 = vweird.f32 %v94_v9 }
  0x88   :  { %95 = vrcp.f32 %v37_v10  ;;  %vm45_vm3 = vmor %vm43_vm2, %vm44_vm1  ;;  %v63_v24 = vand.u32 2147483648, %v37_v10  ;;  %v61_v26 = vand.u32 2147483647, %v37_v10  ;;  %vm57_vm6 = vweird.f32 %v37_v10 }
  0x89   :  { %v40_v12 = vsub.f32 1.0, %v39_v11 }
  0x8a   :  { %v64_v28 = vor.u32 1.1754944e-38, %v63_v24  ;;  %vm62_vm8 = vcmp.eq.f32.partialorder %v61_v26, 8.507059e+37 }
  0x8b   :  { %v41_v14 = vmul.f32 %v94_v9, %v40_v12 }
  0x8d   :  { %v42_v16 = vadd.f32 %v94_v9, %v41_v14 }
  0x8e   :  { %v96_v17 = vpop.eup %95 }
  0x8f   :  { %v53_v19 = vmul.f32 %v96_v17, %v37_v10  ;;  %v46_v20 = vsel %vm45_vm3, %v94_v9, %v42_v16  ;;  %vm58_vm5 = vweird.f32 %v96_v17 }
  0x90   :  { %v51_v21 = vsel %vm48_vm4, %v50_v18, %v46_v20  ;;  %vm59_vm7 = vmor %vm57_vm6, %vm58_vm5 }
  0x91   :  { %v54_v22 = vsub.f32 1.0, %v53_v19  ;;  %v66_v23 = vmul.f32 %v51_v21, %v25_v0 }
  0x93   :  { %v55_v25 = vmul.f32 %v96_v17, %v54_v22  ;;  %68 = vst.msk [vmem:[#allocation5] sm:$0xff] %vm29_vm0, %v66_v23 }
  0x95   :  { %v56_v27 = vadd.f32 %v96_v17, %v55_v25 }
  0x97   :  { %v60_v29 = vsel %vm59_vm7, %v96_v17, %v56_v27 }
  0x98   :  { %v65_v30 = vsel %vm62_vm8, %v64_v28, %v60_v29 }
  0x99   :  { %v67_v31 = vmul.f32 %v65_v30, %v26_v2 }
  0x9b   :  { %69 = vst.msk [vmem:[#allocation5 + $0x8] sm:$0xff] %vm29_vm0, %v67_v31 }
  0x9c   :  { %82 = dma.vmem_to_hbm [thread:$0]  %s75_s13, 256, %s77_s16, [#allocation4], %s150_s11, %s150_s11, %s151_s12  }
  0x9d   :  { %147 = dma.done.wait [#allocation4], 256  }
  0x9e   :  { %148 = vsyncadd [#allocation4], 4294967040 }
  0x9f   :  { %87 = vsyncpa [#allocation3], 1 }
  0xa0   :  { %88 = vsyncpa [#allocation4], 1 }

</bundles_post_ra>
